<compile_context>
chip_gen: v7x
topology: tpu7x:2x2x1
jax: 0.10.0
libtpu: 0.0.40
codegen_flags: <defaults>
</compile_context>

<pallas_src>
import functools
import math

import jax
import jax.numpy as jnp
from jax.experimental import pallas as pl
from jax.experimental.pallas import tpu as pltpu


def _conv2d_im2col_kernel(x_ref, w_ref, o_ref, *, K, C, TH, OW, stride, relu):
    """One (batch, row-tile) grid step: im2col + a single MXU matmul.

    x_ref : (1, HP, WP, C)       padded NHWC image (whole image, bf16)
    w_ref : (OC, K*K*C + 1)      weights with bias folded in as last column
    o_ref : (1, OC, TH*OW)       lane-dense output tile (f32)
    """
    t = pl.program_id(1)
    row_step = TH * stride
    row0 = pl.multiple_of(t * row_step, row_step)
    win_h = (TH - 1) * stride + K               # input rows needed by tile

    # Load the haloed row window once; all further slicing is on the value
    # (avoids repeated unaligned ref slices).
    x_win = x_ref[0, pl.ds(row0, win_h), :, :]  # (win_h, WP, C)

    cols = []
    for ky in range(K):                          # small static unrolled loops
        for kx in range(K):
            if stride == 1:
                sl = x_win[ky:ky + TH, kx:kx + OW, :]
            else:
                sl = x_win[ky:ky + (TH - 1) * stride + 1:stride,
                           kx:kx + (OW - 1) * stride + 1:stride, :]
            cols.append(sl.reshape(TH * OW, C))  # (TH*OW, C)
    # Ones column pairs with the bias column folded into w_ref.
    cols.append(jnp.ones((TH * OW, 1), dtype=x_win.dtype))
    patches = jnp.concatenate(cols, axis=-1)     # (TH*OW, K*K*C + 1)

    # "NT" matmul (same dim-numbers as flash-attention q@k.T):
    # (OC, D) x (TH*OW, D) -> (OC, TH*OW), accumulate in f32.
    acc = jax.lax.dot_general(
        w_ref[...], patches,
        dimension_numbers=(((1,), (1,)), ((), ())),
        preferred_element_type=jnp.float32)
    if relu:
        acc = jnp.maximum(acc, 0.0)
    o_ref[0] = acc.astype(o_ref.dtype)


def _pick_row_tile(OH, OW):
    """Largest TH < OH with TH | OH and TH*OW a multiple of 128 (dense lanes).

    Falls back to the whole image (block == full array dims, always legal).
    """
    best = OH
    for th in range(1, OH):
        if OH % th == 0 and (th * OW) % 128 == 0 and th * OW <= 2048:
            best = th
    return best


def basic_conv_forward(x_nchw, weight_oikk, bias_o, *, kernel_size, stride,
                       relu=False):
    """Forward pass of BasicConv (non-transpose path). NCHW in / NCHW out."""
    N, C, H, W = x_nchw.shape
    OC = weight_oikk.shape[0]
    K = kernel_size

    # Padding exactly as in the PyTorch module (non-transpose branch).
    if stride > 1:
        # ZeroPad2d((left, right, top, bottom)) = (0, K//2, 0, K//2), conv pad=0
        pad_t, pad_b, pad_l, pad_r = 0, K // 2, 0, K // 2
    else:
        p = K // 2
        pad_t = pad_b = pad_l = pad_r = p

    HP = H + pad_t + pad_b
    WP = W + pad_l + pad_r
    OH = (HP - K) // stride + 1
    OW = (WP - K) // stride + 1

    # NHWC + zero pad in the wrapper (tiny; XLA fuses transpose+pad into one
    # pass); bf16 inputs for the MXU.  The output side needs no transpose at
    # all: the kernel emits N, C, (H*W) directly.
    # TODO(synk): for large images, replace the whole-image input block with a
    #             manually DMA'd haloed row window (pl.ANY + make_async_copy).
    x = jnp.transpose(x_nchw, (0, 2, 3, 1))
    x = jnp.pad(x, ((0, 0), (pad_t, pad_b), (pad_l, pad_r), (0, 0)))
    x = x.astype(jnp.bfloat16)

    # Weight matrix (OC, K*K*C + 1): columns ordered (ky, kx, ci), bias last.
    D = K * K * C + 1
    w2 = jnp.transpose(weight_oikk, (0, 2, 3, 1)).reshape(OC, K * K * C)
    w2 = jnp.concatenate([w2, bias_o.reshape(OC, 1)], axis=-1)
    w2 = w2.astype(jnp.bfloat16)

    TH = _pick_row_tile(OH, OW)
    num_t = OH // TH

    kernel = functools.partial(_conv2d_im2col_kernel, K=K, C=C, TH=TH, OW=OW,
                               stride=stride, relu=relu)

    out = pl.pallas_call(
        kernel,
        out_shape=jax.ShapeDtypeStruct((N, OC, OH * OW), jnp.float32),
        grid_spec=pltpu.PrefetchScalarGridSpec(
            num_scalar_prefetch=0,
            grid=(N, num_t),
            in_specs=[
                # Whole padded image per batch element; index is constant over
                # the row-tile axis so Pallas fetches it once per n.
                pl.BlockSpec((1, HP, WP, C), lambda n, t: (n, 0, 0, 0)),
                pl.BlockSpec((OC, D), lambda n, t: (0, 0)),
            ],
            out_specs=pl.BlockSpec((1, OC, TH * OW), lambda n, t: (n, 0, t)),
        ),
        compiler_params=pltpu.CompilerParams(
            dimension_semantics=("parallel", "parallel"),
            # Blocks here are tiny; 32 MiB scoped VMEM fits every generation,
            # including v7x's 64 MiB physical VMEM.
            vmem_limit_bytes=32 * 1024 * 1024,
        ),
    )(x, w2)

    return out.reshape(N, OC, OH, OW)


def _reference_conv(x_nchw, weight_oikk, bias_o, *, kernel_size, stride, relu):
    """Pure-JAX reference mirroring the same PyTorch semantics."""
    K = kernel_size
    if stride > 1:
        x = jnp.pad(x_nchw, ((0, 0), (0, 0), (0, K // 2), (0, K // 2)))
        pad = "VALID"
    else:
        x = x_nchw
        pad = [(K // 2, K // 2), (K // 2, K // 2)]
    y = jax.lax.conv_general_dilated(
        x, weight_oikk, window_strides=(stride, stride), padding=pad,
        dimension_numbers=("NCHW", "OIHW", "NCHW"))
    y = y + bias_o[None, :, None, None]
    if relu:
        y = jnp.maximum(y, 0.0)
    return y


if __name__ == "__main__":
    # BasicConv(in_channel=4, out_channel=8, kernel_size=3, stride=1,
    #           bias=True, relu=True)
    N, C, H, W = 2, 4, 16, 16
    OC, K, STRIDE, RELU = 8, 3, 1, True

    key = jax.random.PRNGKey(0)
    k_x, k_w, k_b = jax.random.split(key, 3)

    x = jax.random.normal(k_x, (N, C, H, W), dtype=jnp.float32)
    fan_in = C * K * K
    bound = 1.0 / math.sqrt(fan_in)
    weight = jax.random.uniform(k_w, (OC, C, K, K), jnp.float32, -bound, bound)
    bias = jax.random.uniform(k_b, (OC,), jnp.float32, -bound, bound)

    out = basic_conv_forward(x, weight, bias, kernel_size=K, stride=STRIDE,
                             relu=RELU)
    out = jax.block_until_ready(out)

    # Reference on bf16-rounded operands (kernel feeds the MXU bf16 but
    # accumulates in f32), plus a loose sanity check against full f32.
    xb = x.astype(jnp.bfloat16).astype(jnp.float32)
    wb = weight.astype(jnp.bfloat16).astype(jnp.float32)
    bb = bias.astype(jnp.bfloat16).astype(jnp.float32)
    ref_bf16 = _reference_conv(xb, wb, bb, kernel_size=K, stride=STRIDE,
                               relu=RELU)
    ref_f32 = _reference_conv(x, weight, bias, kernel_size=K, stride=STRIDE,
                              relu=RELU)

    assert out.shape == ref_bf16.shape, (out.shape, ref_bf16.shape)
    err = float(jnp.max(jnp.abs(out - ref_bf16)))
    assert err < 1e-3, err
    sanity = float(jnp.max(jnp.abs(out - ref_f32)))
    assert sanity < 0.1, sanity

    print("KERNEL_OK")
</pallas_src>

<mosaic_0001>
module attributes {stable_mosaic.version = 11 : i64} {
  func.func @_conv2d_im2col_kernel(%arg0: i32, %arg1: i32, %arg2: memref<1x18x18x4xbf16, #tpu.memory_space<vmem>>, %arg3: memref<8x37xbf16, #tpu.memory_space<vmem>>, %arg4: memref<1x8x128xf32, #tpu.memory_space<vmem>>) attributes {dimension_semantics = [#tpu.dimension_semantics<parallel>, #tpu.dimension_semantics<parallel>], iteration_bounds = array<i64: 2, 2>, scalar_prefetch = 0 : i64, scratch_operands = 0 : i64, tpu.core_type = #tpu.core_type<tc>, window_params = [{transform_indices = @transform_0, window_bounds = array<i64: 1, 18, 18, 4>}, {pipeline_mode = #tpu.pipeline_mode<synchronous>, transform_indices = @transform_1, window_bounds = array<i64: 8, 37>}, {transform_indices = @transform_2, window_bounds = array<i64: 1, 8, 128>}]} {
    %c8_i32 = arith.constant 8 : i32
    %0 = arith.muli %arg1, %c8_i32 : i32
    %1 = tpu.assume_multiple %0, 8 : i32
    %c0 = arith.constant 0 : index
    %2 = arith.index_cast %1 : i32 to index
    %c0_0 = arith.constant 0 : index
    %c0_1 = arith.constant 0 : index
    %3 = vector.load %arg2[%c0, %2, %c0_0, %c0_1] : memref<1x18x18x4xbf16, #tpu.memory_space<vmem>>, vector<1x10x18x4xbf16>
    %4 = vector.shape_cast %3 : vector<1x10x18x4xbf16> to vector<10x18x4xbf16>
    %5 = vector.extract_strided_slice %4 {offsets = [0, 0, 0], sizes = [8, 16, 4], strides = [1, 1, 1]} : vector<10x18x4xbf16> to vector<8x16x4xbf16>
    %6 = vector.shape_cast %5 : vector<8x16x4xbf16> to vector<128x4xbf16>
    %7 = vector.extract_strided_slice %4 {offsets = [0, 1, 0], sizes = [8, 16, 4], strides = [1, 1, 1]} : vector<10x18x4xbf16> to vector<8x16x4xbf16>
    %8 = vector.shape_cast %7 : vector<8x16x4xbf16> to vector<128x4xbf16>
    %9 = vector.extract_strided_slice %4 {offsets = [0, 2, 0], sizes = [8, 16, 4], strides = [1, 1, 1]} : vector<10x18x4xbf16> to vector<8x16x4xbf16>
    %10 = vector.shape_cast %9 : vector<8x16x4xbf16> to vector<128x4xbf16>
    %11 = vector.extract_strided_slice %4 {offsets = [1, 0, 0], sizes = [8, 16, 4], strides = [1, 1, 1]} : vector<10x18x4xbf16> to vector<8x16x4xbf16>
    %12 = vector.shape_cast %11 : vector<8x16x4xbf16> to vector<128x4xbf16>
    %13 = vector.extract_strided_slice %4 {offsets = [1, 1, 0], sizes = [8, 16, 4], strides = [1, 1, 1]} : vector<10x18x4xbf16> to vector<8x16x4xbf16>
    %14 = vector.shape_cast %13 : vector<8x16x4xbf16> to vector<128x4xbf16>
    %15 = vector.extract_strided_slice %4 {offsets = [1, 2, 0], sizes = [8, 16, 4], strides = [1, 1, 1]} : vector<10x18x4xbf16> to vector<8x16x4xbf16>
    %16 = vector.shape_cast %15 : vector<8x16x4xbf16> to vector<128x4xbf16>
    %17 = vector.extract_strided_slice %4 {offsets = [2, 0, 0], sizes = [8, 16, 4], strides = [1, 1, 1]} : vector<10x18x4xbf16> to vector<8x16x4xbf16>
    %18 = vector.shape_cast %17 : vector<8x16x4xbf16> to vector<128x4xbf16>
    %19 = vector.extract_strided_slice %4 {offsets = [2, 1, 0], sizes = [8, 16, 4], strides = [1, 1, 1]} : vector<10x18x4xbf16> to vector<8x16x4xbf16>
    %20 = vector.shape_cast %19 : vector<8x16x4xbf16> to vector<128x4xbf16>
    %21 = vector.extract_strided_slice %4 {offsets = [2, 2, 0], sizes = [8, 16, 4], strides = [1, 1, 1]} : vector<10x18x4xbf16> to vector<8x16x4xbf16>
    %22 = vector.shape_cast %21 : vector<8x16x4xbf16> to vector<128x4xbf16>
    %cst = arith.constant 1.000000e+00 : bf16
    %23 = vector.broadcast %cst : bf16 to vector<128x1xbf16>
    %24 = tpu.concatenate %6, %8, %10, %12, %14, %16, %18, %20, %22, %23 in 1 : vector<128x4xbf16>, vector<128x4xbf16>, vector<128x4xbf16>, vector<128x4xbf16>, vector<128x4xbf16>, vector<128x4xbf16>, vector<128x4xbf16>, vector<128x4xbf16>, vector<128x4xbf16>, vector<128x1xbf16> -> vector<128x37xbf16>
    %c0_2 = arith.constant 0 : index
    %c0_3 = arith.constant 0 : index
    %25 = vector.load %arg3[%c0_2, %c0_3] : memref<8x37xbf16, #tpu.memory_space<vmem>>, vector<8x37xbf16>
    %cst_4 = arith.constant dense<0.000000e+00> : vector<8x128xf32>
    %26 = tpu.matmul %25, %24, %cst_4 {dimension_numbers = #tpu.dot_dimension_numbers<[1], [1], [0], [0], [0, 0, 1, 0], [], []>} : vector<8x37xbf16>, vector<128x37xbf16>, vector<8x128xf32> -> vector<8x128xf32>
    %cst_5 = arith.constant 0.000000e+00 : f32
    %27 = vector.broadcast %cst_5 : f32 to vector<8x128xf32>
    %28 = arith.maximumf %26, %27 : vector<8x128xf32>
    %c0_6 = arith.constant 0 : index
    %c0_7 = arith.constant 0 : index
    %c0_8 = arith.constant 0 : index
    %29 = vector.load %arg4[%c0_6, %c0_7, %c0_8] : memref<1x8x128xf32, #tpu.memory_space<vmem>>, vector<1x8x128xf32>
    %30 = vector.shape_cast %29 : vector<1x8x128xf32> to vector<8x128xf32>
    %31 = vector.shape_cast %28 : vector<8x128xf32> to vector<1x8x128xf32>
    tpu.vector_store %arg4[%c0_6, %c0_7, %c0_8], %31 {strides = array<i32>} : memref<1x8x128xf32, #tpu.memory_space<vmem>>, vector<1x8x128xf32>,
    return
  }
  func.func @transform_0(%arg0: i32, %arg1: i32) -> (i32, i32, i32, i32) {
    %c0_i32 = arith.constant 0 : i32
    %c0_i32_0 = arith.constant 0 : i32
    %c0_i32_1 = arith.constant 0 : i32
    %c0_i32_2 = arith.constant 0 : i32
    return %arg0, %c0_i32, %c0_i32_0, %c0_i32_1 : i32, i32, i32, i32
  }
  func.func @transform_1(%arg0: i32, %arg1: i32) -> (i32, i32) {
    %c0_i32 = arith.constant 0 : i32
    %c0_i32_0 = arith.constant 0 : i32
    %c0_i32_1 = arith.constant 0 : i32
    return %c0_i32, %c0_i32_0 : i32, i32
  }
  func.func @transform_2(%arg0: i32, %arg1: i32) -> (i32, i32, i32) {
    %c0_i32 = arith.constant 0 : i32
    %c0_i32_0 = arith.constant 0 : i32
    return %arg0, %c0_i32, %arg1 : i32, i32, i32
  }
}

</mosaic_0001>

<bundles_post_ra>
// kernel: tpu_custom_call.1
= control target key start
LH: loop header
LB: loop body
LE: loop exit
PB: predicated region body
PF: predicated region fallthrough
CT: control target
= control target key end

     0   :  { %7 = vsyncpa [#allocation3], 0  ;;  %s2001_s0 = inlined_call_operand.vmem [shape: bf16[2,18,18,4], index: 0, kind: input, shape index: {}]   ;;  %s2002_s1 = inlined_call_operand.vmem [shape: bf16[8,37], index: 1, kind: input, shape index: {}]   ;;  %s2003_s2 = inlined_call_operand.hbm [shape: f32[2,8,256], index: 2, kind: output, shape index: {}]  }
   0x1   :  { %9 = vsyncpa [#allocation3 + $0x1], 0  ;;  %s1363_s9 = smov 0   ;;  %s1365_s10 = smov 0  }
   0x2   :  { %s1367_s11 = smov 0   ;;  %s1369_s12 = smov 0  }
   0x3   :  { %s1371_s13 = smov 0   ;;  %s1373_s14 = smov 0  }
   0x4   :  { %s1375_s15 = smov 0   ;;  %s1377_s16 = smov 0  }
   0x5 LB: > { %s1063_s17 = sadd.s32 4294967295, %s1335_s16   ;;  %s1064_s18 = sadd.s32 4294967294, %s1335_s16   ;;  %s1335_s16 = sphi %s1377_s16, %s15_s16   ;;  %s1331_s15 = sphi %s1375_s15, %s2016_s15   ;;  %s1327_s14 = sphi %s1373_s14, %s2015_s14   ;;  %s1323_s13 = sphi %s1371_s13, %s2014_s13   ;;  %s1319_s12 = sphi %s1369_s12, %s2013_s12   ;;  %s1315_s11 = sphi %s1367_s11, %s2012_s11   ;;  %s1311_s10 = sphi %s1365_s10, %s2011_s10   ;;  %s1307_s9 = sphi %s1363_s9, %s2010_s9  }
   0x6   : > { %s24_s19 = sadd.s32 1, %s1327_s14  ;;  %s27_s20 = sadd.s32 1, %s1331_s15 }
   0x7   : > { %p25_p0 = scmp.ge.s32.totalorder %s24_s19, 2  ;;  %p93_p1 = scmp.ne.s32.totalorder %s1315_s11, %s1311_s10 }
   0x8   : > { %p94_p2 = scmp.eq.s32.totalorder %s1063_s17, 3  ;;  %p99_p5 = scmp.ne.s32.totalorder %s1311_s10, %s1307_s9 }
   0x9   : > { %s2018_s19 = smov (%p25_p0, %s24_s19), 0  ;;  %s2020_s20 = smov (!%p25_p0, %s27_s20), %s1331_s15 }
   0xa   : > { %s79_s21 = ssub.s32 %s1327_s14, %s2018_s19  ;;  %p1414_p3 = por %p94_p2, %p93_p1 }
   0xb   : > { %p29_p4 = scmp.ge.s32.totalorder %s2020_s20, 2  ;;  %p100_p6 = scmp.eq.s32.totalorder %s1064_s18, 3 }
   0xc   : > { %p1067_p7 = scmp.ge.s32.totalorder %s1335_s16, 1  ;;  %p129_p9 = scmp.lt.s32.totalorder %s1335_s16, 5 }
   0xd   : > { %s2022_s20 = smov (%p29_p4, %s2020_s20), 0  ;;  %p1423_p8 = por %p100_p6, %p99_p5 }
   0xe   : > { %s78_s24 = ssub.s32 %s1331_s15, %s2022_s20  ;;  %s83_s25 = sadd.s32 1, %s1315_s11 }
   0xf   : > { %s80_s26 = sor.u32 %s79_s21, %s78_s24  ;;  %p130_p10 = pnand %p1067_p7, %p129_p9 }
  0x10   : > { %p81_p11 = scmp.eq.s32.totalorder %s80_s26, 0  ;;  %p151_p12 = scmp.lt.s32.totalorder (!%p130_p10), %s1323_s13, 1  ;;  %vm411_vm0 = vcmask (!%p130_p10), 1042432   ;;  %vm412_vm1 = vcmask (!%p130_p10), 1046532   ;;  %vm192_vm2 = vsmask.f32 (!%p130_p10), 3328 }
  0x11   : > { %133 = sbr.rel (%p130_p10) target bundleno = 518 (0x206), region = 28  ;;  %vm193_vm3 = vsmask.f32 (!%p130_p10), 7440  ;;  %s1337_s7 = smov (!%p130_p10), 12   ;;  %vm1476_vm4 = vmor (!%p130_p10), %vm411_vm0, %vm412_vm1  ;;  %vm1346_vm6 = vmmov (!%p130_p10), 0   ;;  %vm756_vm7 = vcmask (!%p130_p10), 31744  }
  0x12   : > { %s1432_s27 = scalar_select %p81_p11, %s1315_s11, %s83_s25  }
  0x13   : > { %s1119_s29 = smul.u32 (!%p130_p10), 96, %s1319_s12  ;;  %s1338_s8 = smov (!%p130_p10), 24   ;;  %vm1518_vm5 = vmor (!%p130_p10), %vm192_vm2, %vm193_vm3  ;;  %vm781_vm8 = vcmask (!%p130_p10), 64512   ;;  %vm798_vm9 = vcmask (!%p130_p10), 97280   ;;  %vm815_vm10 = vcmask (!%p130_p10), 130048   ;;  %vm832_vm11 = vcmask (!%p130_p10), 162816  }
  0x14   : > { %s1339_s17 = smov (!%p130_p10), 8   ;;  %s1340_s18 = smov (!%p130_p10), 32   ;;  %vm849_vm12 = vcmask (!%p130_p10), 195584   ;;  %vm866_vm13 = vcmask (!%p130_p10), 228352   ;;  %vm883_vm14 = vcmask (!%p130_p10), 261120   ;;  %vm900_vm15 = vcmask (!%p130_p10), 293888  }
  0x15   : > { %s1341_s21 = smov (!%p130_p10), 20   ;;  %s1342_s24 = smov (!%p130_p10), 4   ;;  %vm911_vm0 = vcmask (!%p130_p10), 302080  }
  0x16   : > { %s1343_s25 = smov (!%p130_p10), 16   ;;  %s1344_s26 = smov (!%p130_p10), 28  }
  0x17   : > { %s1115_s4 = sshll.u32 (!%p130_p10), %s1323_s13, 1 }
  0x18   : > { %s152_s28 = scalar_select %p151_p12, %s1323_s13, 1 }
  0x1a   : > { %s1149_s30 = smul.u32 216, %s152_s28 }
  0x1c   : > { %s155_s5 = scalar_lea.vmem %s2001_s0, %s1149_s30  ;;  %s148_s30 = sand.u32 1, %s1311_s10  }
  0x1d   : > { %s1440_s6 = scalar_lea.vmem %s155_s5, %s1119_s29  ;;  %s1068_s3 = sshll.u32 %s148_s30, 3 }
  0x1e   : > { %v165_v0 = vld [vmem:[%s1440_s6 + $0xc] sm:$0xf]  ;;  %v1444_v1 = vld [vmem:[%s1440_s6 + $0x10] sm:$0xf]  ;;  %v1447_v2 = vld [vmem:[%s1440_s6 + $0x18] sm:$0xf]  ;;  %s985_s5 = sadd.s32 %s1319_s12, %s1115_s4 }
  0x1f   : > { %v229_v3 = vshll.u32 %v1444_v1, 16  ;;  %v233_v4 = vshrl.u32 %v1444_v1, 16  ;;  %v1452_v5 = vcombine.low %v165_v0, %v1444_v1  ;;  %v220_v6 = vshrl.u32 %v165_v0, 16  ;;  %v1455_v7 = vld [vmem:[%s1440_s6 + $0x1c] sm:$0xf]  ;;  %s974_s12 = scalar_lea.sflag [#allocation3], %s148_s30 }
  0x20   : > { %v223_v8 = vshll.u32 %v165_v0, 16  ;;  %v257_v9 = vshrl.u32 %v1455_v7, 16  ;;  %v1460_v10 = vcombine.low %v1447_v2, %v1455_v7  ;;  %v244_v11 = vshrl.u32 %v1447_v2, 16  ;;  %v1464_v12 = vld [vmem:[%s1440_s6] sm:$0xf] }
  0x21   : > { %v1466_v13 = vrot.slane %v233_v4, 4  ;;  %645 = vrot.lane.b32.xlu1 %v1452_v5, %s1337_s7  ;;  %v222_v14 = vrot.slane %v220_v6, 4  ;;  %v247_v15 = vshll.u32 %v1447_v2, 16  ;;  %v1472_v16 = vld [vmem:[%s1440_s6 + $0x4] sm:$0xf]  ;;  %v1073_v18 = vrot.slane %v1464_v12, 9 }
  0x22   : > { %v225_v19 = vrot.slane %v223_v8, 5  ;;  %647 = vrot.lane.b32.xlu0 %v1460_v10, %s1337_s7  ;;  %v164_v20 = vld [vmem:[%s1440_s6 + $0x8] sm:$0x1]  ;;  %v416_v21 = vrot.slane %v1472_v16, 5  ;;  %v1486_v22 = vld [vmem:[%s1440_s6 + $0x20] sm:$0x1] }
  0x23   : > { %v419_v23 = vrot.slane %v164_v20, 5  ;;  %v1075_v24 = vrot.slane %v1447_v2, 9  ;;  %v430_v25 = vrot.slane %v1455_v7, 5  ;;  %v433_v26 = vrot.slane %v1486_v22, 5  ;;  %v167_v27 = vld [vmem:[%s1440_s6 + $0x14] sm:$0x1] }
  0x24   : > { %v417_v28 = vsel %vm1476_vm4, %v1073_v18, %v416_v21  ;;  %v418_v29 = vrot.slane %v416_v21, 4  ;;  %v1074_v30 = vrot.slane %v165_v0, 9  ;;  %v423_v31 = vrot.slane %v1444_v1, 5  ;;  %v171_v1 = vld [vmem:[%s1440_s6 + $0x24] sm:$0xf] }
  0x25   : > { %702 = vrot.lane.b32.xlu1 %v1460_v10, %s1338_s8  ;;  %v431_v32 = vsel %vm1476_vm4, %v1075_v24, %v430_v25  ;;  %v432_v33 = vrot.slane %v430_v25, 4  ;;  %v426_v34 = vrot.slane %v167_v27, 5  ;;  %v196_v35 = vshrl.u32 %v1464_v12, 16  ;;  %v172_v8 = vld [vmem:[%s1440_s6 + $0x28] sm:$0xf] }
  0x26   : > { %v420_v36 = vsel %vm1476_vm4, %v418_v29, %v419_v23  ;;  %v424_v37 = vsel %vm1476_vm4, %v1074_v30, %v423_v31  ;;  %v425_v38 = vrot.slane %v423_v31, 4  ;;  %v199_v39 = vshll.u32 %v1464_v12, 16  ;;  %v173_v24 = vld [vmem:[%s1440_s6 + $0x2c] sm:$0x1]  ;;  %v1541_v31 = vld [vmem:[%s1440_s6 + $0x30] sm:$0xf] }
  0x27   : > { %v1099_v40 = vcombine.low %v417_v28, %v420_v36  ;;  %v434_v41 = vsel %vm1476_vm4, %v432_v33, %v433_v26  ;;  %v198_v42 = vrot.slane %v196_v35, 4  ;;  %v205_v43 = vshll.u32 %v1472_v16, 16 }
  0x28   : > { %v1508_v44 = vcombine.low %v431_v32, %v434_v41  ;;  %v427_v45 = vsel %vm1476_vm4, %v425_v38, %v426_v34  ;;  %v201_v46 = vrot.slane %v199_v39, 5  ;;  %v209_v47 = vshrl.u32 %v1472_v16, 16 }
  0x29   : > { %626 = vrot.lane.b32.xlu0 %v1099_v40, %s1339_s17  ;;  %v1100_v48 = vcombine.low %v424_v37, %v427_v45  ;;  %v207_v49 = vrot.slane %v205_v43, 5  ;;  %v215_v50 = vshll.u32 %v164_v20, 16  ;;  %v226_v51 = vor.u32 %v225_v19, %v222_v14  ;;  %v175_v40 = vld [vmem:[%s1440_s6 + $0x34] sm:$0xf] }
  0x2a   : > { %740 = vrot.lane.b32.xlu1 %v1508_v44, %s1340_s18  ;;  %v202_v52 = vor.u32 %v201_v46, %v198_v42  ;;  %v211_v53 = vrot.slane %v209_v47, 4  ;;  %v231_v54 = vrot.slane %v229_v3, 5  ;;  %v239_v55 = vshll.u32 %v167_v27, 16 }
  0x2b   : > { %v217_v57 = vrot.slane %v215_v50, 5  ;;  %v227_v58 = vrot.slane %v226_v51, 4  ;;  %v246_v59 = vrot.slane %v244_v11, 4  ;;  %v249_v60 = vrot.slane %v247_v15, 5 }
  0x2c   : > { %v203_v61 = vrot.slane %v202_v52, 4  ;;  %v212_v62 = vor.u32 %v211_v53, %v207_v49  ;;  %v236_v63 = vor.u32 %v1466_v13, %v231_v54  ;;  %v241_v0 = vrot.slane %v239_v55, 5 }
  0x2d   : > { %683 = vrot.lane.b32.xlu0 %v1100_v48, %s1341_s21  ;;  %v232_v2 = vsel %vm1518_vm5, %v227_v58, %v231_v54  ;;  %v250_v3 = vor.u32 %v249_v60, %v246_v59  ;;  %v253_v4 = vshll.u32 %v1455_v7, 16  ;;  %v259_v6 = vrot.slane %v257_v9, 4 }
  0x2e   : > { %628 = vrot.lane.b32.xlu1 %v1100_v48, %s1339_s17  ;;  %v208_v11 = vsel %vm1518_vm5, %v203_v61, %v207_v49  ;;  %v213_v13 = vrot.slane %v212_v62, 4  ;;  %v237_v14 = vrot.slane %v236_v63, 4  ;;  %v263_v15 = vshll.u32 %v1486_v22, 16  ;;  %v176_v49 = vld [vmem:[%s1440_s6 + $0x38] sm:$0x1] }
  0x2f   : > { %v251_v18 = vrot.slane %v250_v3, 4  ;;  %v255_v19 = vrot.slane %v253_v4, 5  ;;  %v268_v20 = vshrl.u32 %v171_v1, 16  ;;  %v271_v21 = vshll.u32 %v171_v1, 16  ;;  %v1566_v63 = vld [vmem:[%s1440_s6 + $0x3c] sm:$0xf] }
  0x30   : > { %v218_v23 = vsel %vm1518_vm5, %v213_v13, %v217_v57  ;;  %v242_v7 = vsel %vm1518_vm5, %v237_v14, %v241_v0  ;;  %v281_v9 = vshrl.u32 %v172_v8, 16  ;;  %v265_v28 = vrot.slane %v263_v15, 5 }
  0x31   : > { %v1091_v25 = vcombine.low %v208_v11, %v218_v23  ;;  %v1092_v26 = vcombine.low %v232_v2, %v242_v7  ;;  %v260_v27 = vor.u32 %v259_v6, %v255_v19  ;;  %v270_v29 = vrot.slane %v268_v20, 4  ;;  %v1584_v23 = vld [vmem:[%s1440_s6 + $0x44] sm:$0x1] }
  0x32   : > { %v273_v22 = vrot.slane %v271_v21, 5  ;;  %v277_v30 = vshll.u32 %v172_v8, 16  ;;  %v256_v32 = vsel %vm1518_vm5, %v251_v18, %v255_v19  ;;  %v283_v34 = vrot.slane %v281_v9, 4 }
  0x33   : > { %586 = vrot.lane.b32.xlu0 %v1091_v25, %s1342_s24  ;;  %664 = vrot.lane.b32.xlu1 %v1092_v26, %s1343_s25  ;;  %v261_v33 = vrot.slane %v260_v27, 4  ;;  %v287_v35 = vshll.u32 %v173_v24, 16  ;;  %v1076_v38 = vrot.slane %v171_v1, 9  ;;  %v437_v39 = vrot.slane %v172_v8, 5  ;;  %v1589_v27 = vld [vmem:[%s1440_s6 + $0x48] sm:$0xf] }
  0x34   : > { %v274_v36 = vor.u32 %v273_v22, %v270_v29  ;;  %v279_v37 = vrot.slane %v277_v30, 5  ;;  %v440_v42 = vrot.slane %v173_v24, 5  ;;  %v292_v43 = vshrl.u32 %v1541_v31, 16 }
  0x35   : > { %v266_v41 = vsel %vm1518_vm5, %v261_v33, %v265_v28  ;;  %v295_v45 = vshll.u32 %v1541_v31, 16  ;;  %v1554_v47 = vcombine.low %v171_v1, %v172_v8  ;;  %v439_v51 = vrot.slane %v437_v39, 4  ;;  %v1574_v8 = vld [vmem:[%s1440_s6 + $0x40] sm:$0xf] }
  0x36   : > { %v1552_v46 = vcombine.low %v256_v32, %v266_v41  ;;  %v284_v48 = vor.u32 %v283_v34, %v279_v37  ;;  %v275_v50 = vrot.slane %v274_v36, 4  ;;  %v305_v52 = vshrl.u32 %v175_v40, 16  ;;  %v1603_v32 = vld [vmem:[%s1440_s6 + $0x4c] sm:$0xf] }
  0x37   : > { %v294_v53 = vrot.slane %v292_v43, 4  ;;  %v289_v54 = vrot.slane %v287_v35, 5  ;;  %v438_v55 = vsel %vm1476_vm4, %v1076_v38, %v437_v39  ;;  %v297_v57 = vrot.slane %v295_v45, 5  ;;  %v182_v45 = vld [vmem:[%s1440_s6 + $0x50] sm:$0x1] }
  0x38   : > { %721 = vrot.lane.b32.xlu0 %v1552_v46, %s1344_s26  ;;  %666 = vrot.lane.b32.xlu1 %v1552_v46, %s1343_s25  ;;  %v301_v58 = vshll.u32 %v175_v40, 16  ;;  %v285_v59 = vrot.slane %v284_v48, 4  ;;  %v441_v60 = vsel %vm1476_vm4, %v439_v51, %v440_v42  ;;  %v307_v61 = vrot.slane %v305_v52, 4 }
  0x39   : > { %v311_v62 = vshll.u32 %v176_v49, 16  ;;  %v298_v0 = vor.u32 %v297_v57, %v294_v53  ;;  %v280_v2 = vsel %vm1518_vm5, %v275_v50, %v279_v37  ;;  %v1570_v3 = vcombine.low %v438_v55, %v441_v60  ;;  %v1640_v57 = vld [vmem:[%s1440_s6 + $0x54] sm:$0xf] }
  0x3a   : > { %v303_v1 = vrot.slane %v301_v58, 5  ;;  %v1077_v4 = vrot.slane %v1541_v31, 9  ;;  %v444_v6 = vrot.slane %v175_v40, 5  ;;  %v447_v13 = vrot.slane %v176_v49, 5 }
  0x3b   : > { %v316_v14 = vshrl.u32 %v1566_v63, 16  ;;  %v319_v15 = vshll.u32 %v1566_v63, 16  ;;  %v290_v18 = vsel %vm1518_vm5, %v285_v59, %v289_v54  ;;  %v299_v19 = vrot.slane %v298_v0, 4 }
  0x3c   : > { %588 = vrot.lane.b32.xlu0 %v1092_v26, %s1342_s24  ;;  %704 = vrot.lane.b32.xlu1 %v1554_v47, %s1338_s8  ;;  %v308_v11 = vor.u32 %v307_v61, %v303_v1  ;;  %v313_v20 = vrot.slane %v311_v62, 5  ;;  %v446_v21 = vrot.slane %v444_v6, 4  ;;  %v329_v9 = vshrl.u32 %v1574_v8, 16 }
  0x3d   : > { %v318_v24 = vrot.slane %v316_v14, 4  ;;  %v321_v25 = vrot.slane %v319_v15, 5  ;;  %v325_v26 = vshll.u32 %v1574_v8, 16  ;;  %v1593_v28 = vcombine.low %v280_v2, %v290_v18 }
  0x3e   : > { %v309_v7 = vrot.slane %v308_v11, 4  ;;  %v445_v29 = vsel %vm1476_vm4, %v1077_v4, %v444_v6  ;;  %v448_v22 = vsel %vm1476_vm4, %v446_v21, %v447_v13  ;;  %v335_v30 = vshll.u32 %v1584_v23, 16 }
  0x3f   : > { %v1606_v33 = vcombine.low %v1541_v31, %v175_v40  ;;  %v304_v34 = vsel %vm1518_vm5, %v299_v19, %v303_v1  ;;  %v322_v36 = vor.u32 %v321_v25, %v318_v24  ;;  %v1614_v37 = vcombine.low %v1566_v63, %v1574_v8  ;;  %v1648_v1 = vld [vmem:[%s1440_s6 + $0x58] sm:$0xf] }
  0x40   : > { %685 = vrot.lane.b32.xlu0 %v1508_v44, %s1341_s21  ;;  %742 = vrot.lane.b32.xlu1 %v1570_v3, %s1340_s18  ;;  %v314_v35 = vsel %vm1518_vm5, %v309_v7, %v313_v20  ;;  %v1616_v38 = vrot.slane %v329_v9, 4  ;;  %v340_v39 = vshrl.u32 %v1589_v27, 16  ;;  %v343_v41 = vshll.u32 %v1589_v27, 16 }
  0x41   : > { %v1620_v31 = vcombine.low %v445_v29, %v448_v22  ;;  %v1622_v40 = vrot.slane %v325_v26, 5  ;;  %v1078_v42 = vrot.slane %v1566_v63, 9  ;;  %v353_v43 = vshrl.u32 %v1603_v32, 16  ;;  %v1670_v26 = vld [vmem:[%s1440_s6 + $0x60] sm:$0xf] }
  0x42   : > { %v1631_v48 = vcombine.low %v304_v34, %v314_v35  ;;  %v1633_v49 = vrot.slane %v335_v30, 5  ;;  %v342_v50 = vrot.slane %v340_v39, 4  ;;  %v345_v51 = vrot.slane %v343_v41, 5  ;;  %v1683_v41 = vld [vmem:[%s1440_s6 + $0x64] sm:$0xf] }
  0x43   : > { %v1635_v52 = vrot.slane %v322_v36, 4  ;;  %v451_v53 = vrot.slane %v1574_v8, 5  ;;  %v349_v54 = vshll.u32 %v1603_v32, 16  ;;  %v355_v55 = vrot.slane %v353_v43, 4 }
  0x44   : > { %723 = vrot.lane.b32.xlu0 %v1593_v28, %s1344_s26  ;;  %630 = vrot.lane.b32.xlu1 %v1508_v44, %s1339_s17  ;;  %v454_v58 = vrot.slane %v1584_v23, 5  ;;  %v346_v59 = vor.u32 %v345_v51, %v342_v50  ;;  %v359_v44 = vshll.u32 %v182_v45, 16  ;;  %v1079_v60 = vrot.slane %v1589_v27, 9 }
  0x45   : > { %v332_v61 = vor.u32 %v1616_v38, %v1622_v40  ;;  %v351_v62 = vrot.slane %v349_v54, 5  ;;  %v458_v63 = vrot.slane %v1603_v32, 5  ;;  %v461_v0 = vrot.slane %v182_v45, 5 }
  0x46   : > { %v1656_v2 = vsel %vm1476_vm4, %v1078_v42, %v451_v53  ;;  %v347_v4 = vrot.slane %v346_v59, 4  ;;  %v361_v6 = vrot.slane %v359_v44, 5  ;;  %v364_v8 = vshrl.u32 %v1640_v57, 16  ;;  %v188_v59 = vld [vmem:[%s1440_s6 + $0x68] sm:$0x1] }
  0x47   : > { %v356_v11 = vor.u32 %v355_v55, %v351_v62  ;;  %v459_v13 = vsel %vm1476_vm4, %v1079_v60, %v458_v63  ;;  %v460_v14 = vrot.slane %v458_v63, 4  ;;  %v367_v15 = vshll.u32 %v1640_v57, 16 }
  0x48   : > { %590 = vrot.lane.b32.xlu0 %v1552_v46, %s1342_s24  ;;  %668 = vrot.lane.b32.xlu1 %v1593_v28, %s1343_s25  ;;  %v185_v46 = vld [vmem:[%s1440_s6 + $0x5c] sm:$0x1]  ;;  %v453_v18 = vrot.slane %v451_v53, 4  ;;  %v352_v19 = vsel %vm1518_vm5, %v347_v4, %v351_v62  ;;  %v377_v20 = vshrl.u32 %v1648_v1, 16  ;;  %v366_v21 = vrot.slane %v364_v8, 4 }
  0x49   : > { %v357_v7 = vrot.slane %v356_v11, 4  ;;  %v462_v9 = vsel %vm1476_vm4, %v460_v14, %v461_v0  ;;  %v369_v24 = vrot.slane %v367_v15, 5  ;;  %v373_v25 = vshll.u32 %v1648_v1, 16  ;;  %v1707_v15 = vld [vmem:[%s1440_s6 + $0x6c] sm:$0xf] }
  0x4a   : > { %v1676_v29 = vcombine.low %v459_v13, %v462_v9  ;;  %v379_v22 = vrot.slane %v377_v20, 4  ;;  %v383_v30 = vshll.u32 %v185_v46, 16  ;;  %v1080_v34 = vrot.slane %v1640_v57, 9 }
  0x4b   : > { %v362_v35 = vsel %vm1518_vm5, %v357_v7, %v361_v6  ;;  %v370_v36 = vor.u32 %v369_v24, %v366_v21  ;;  %v375_v38 = vrot.slane %v373_v25, 5  ;;  %v465_v39 = vrot.slane %v1648_v1, 5  ;;  %v1714_v7 = vld [vmem:[%s1440_s6 + $0x70] sm:$0xf] }
  0x4c   : > { %649 = vrot.lane.b32.xlu0 %v1554_v47, %s1337_s7  ;;  %706 = vrot.lane.b32.xlu1 %v1606_v33, %s1338_s8  ;;  %v1685_v42 = vcombine.low %v352_v19, %v362_v35  ;;  %v385_v43 = vrot.slane %v383_v30, 5  ;;  %v468_v45 = vrot.slane %v185_v46, 5  ;;  %v471_v50 = vshrl.u32 %v1670_v26, 16 }
  0x4d   : > { %v371_v51 = vrot.slane %v370_v36, 4  ;;  %v380_v53 = vor.u32 %v379_v22, %v375_v38  ;;  %v466_v54 = vsel %vm1476_vm4, %v1080_v34, %v465_v39  ;;  %v467_v55 = vrot.slane %v465_v39, 4 }
  0x4e   : > { %v1695_v44 = vrot.slane %v332_v61, 4  ;;  %v474_v60 = vshll.u32 %v1670_v26, 16  ;;  %v484_v62 = vshrl.u32 %v1683_v41, 16  ;;  %v473_v63 = vrot.slane %v471_v50, 4 }
  0x4f   : > { %v376_v0 = vsel %vm1518_vm5, %v371_v51, %v375_v38  ;;  %v381_v4 = vrot.slane %v380_v53, 4  ;;  %v469_v6 = vsel %vm1476_vm4, %v467_v55, %v468_v45  ;;  %v480_v8 = vshll.u32 %v1683_v41, 16  ;;  %v191_v45 = vld [vmem:[%s1440_s6 + $0x74] sm:$0x1]  ;;  %s1116_s6 = sshll.u32 %s985_s5, 7 }
  0x50   : > { %687 = vrot.lane.b32.xlu0 %v1570_v3, %s1341_s21  ;;  %744 = vrot.lane.b32.xlu1 %v1620_v31, %s1340_s18  ;;  %v1704_v11 = vcombine.low %v466_v54, %v469_v6  ;;  %v476_v13 = vrot.slane %v474_v60, 5  ;;  %v486_v61 = vrot.slane %v484_v62, 4  ;;  %v490_v14 = vshll.u32 %v188_v59, 16 }
  0x51   : > { %v386_v46 = vsel %vm1518_vm5, %v381_v4, %v385_v43  ;;  %v482_v19 = vrot.slane %v480_v8, 5  ;;  %v1081_v20 = vrot.slane %v1670_v26, 9  ;;  %v499_v21 = vrot.slane %v1683_v41, 5 }
  0x52   : > { %v1720_v9 = vcombine.low %v376_v0, %v386_v46  ;;  %v477_v24 = vor.u32 %v476_v13, %v473_v63  ;;  %v492_v25 = vrot.slane %v490_v14, 5  ;;  %v502_v22 = vrot.slane %v188_v59, 5 }
  0x53   : > { %v487_v30 = vor.u32 %v486_v61, %v482_v19  ;;  %v500_v34 = vsel %vm1476_vm4, %v1081_v20, %v499_v21  ;;  %v501_v35 = vrot.slane %v499_v21, 4  ;;  %v505_v36 = vshrl.u32 %v1707_v15, 16 }
  0x54   : > { %725 = vrot.lane.b32.xlu0 %v1631_v48, %s1344_s26  ;;  %632 = vrot.lane.b32.xlu1 %v1570_v3, %s1339_s17  ;;  %v455_v38 = vsel %vm1476_vm4, %v453_v18, %v454_v58  ;;  %v478_v39 = vrot.slane %v477_v24, 4  ;;  %v508_v3 = vshll.u32 %v1707_v15, 16  ;;  %v518_v43 = vshrl.u32 %v1714_v7, 16 }
  0x55   : > { %v488_v50 = vrot.slane %v487_v30, 4  ;;  %v503_v51 = vsel %vm1476_vm4, %v501_v35, %v502_v22  ;;  %v507_v53 = vrot.slane %v505_v36, 4  ;;  %v514_v54 = vshll.u32 %v1714_v7, 16 }
  0x56   : > { %v483_v23 = vsel %vm1518_vm5, %v478_v39, %v482_v19  ;;  %v1741_v58 = vcombine.low %v500_v34, %v503_v51  ;;  %v510_v18 = vrot.slane %v508_v3, 5  ;;  %v520_v55 = vrot.slane %v518_v43, 4 }
  0x57   : > { %v493_v59 = vsel %vm1518_vm5, %v488_v50, %v492_v25  ;;  %v516_v60 = vrot.slane %v514_v54, 5  ;;  %v524_v62 = vshll.u32 %v191_v45, 16  ;;  %v1082_v63 = vrot.slane %v1707_v15, 9 }
  0x58   : > { %592 = vrot.lane.b32.xlu0 %v1593_v28, %s1342_s24  ;;  %670 = vrot.lane.b32.xlu1 %v1631_v48, %s1343_s25  ;;  %v1108_v0 = vcombine.low %v483_v23, %v493_v59  ;;  %v511_v4 = vor.u32 %v510_v18, %v507_v53  ;;  %v533_v28 = vrot.slane %v1714_v7, 5  ;;  %v536_v6 = vrot.slane %v191_v45, 5 }
  0x59   : > { %v521_v8 = vor.u32 %v520_v55, %v516_v60  ;;  %v526_v13 = vrot.slane %v524_v62, 5  ;;  %v1083_v61 = vcombine.low %v1464_v12, %v1472_v16  ;;  %v1104_v14 = vcombine.low %v1656_v2, %v455_v38 }
  0x5a   : > { %v512_v46 = vrot.slane %v511_v4, 4  ;;  %v534_v19 = vsel %vm1476_vm4, %v1082_v63, %v533_v28  ;;  %v535_v20 = vrot.slane %v533_v28, 4  ;;  %v328_v21 = vsel %vm1518_vm5, %v1635_v52, %v1622_v40 }
  0x5b   : > { %v338_v24 = vsel %vm1518_vm5, %v1695_v44, %v1633_v49  ;;  %v522_v25 = vrot.slane %v521_v8, 4  ;;  %v1345_v35 = vmov 0.0   ;;  %v1782_v17 = vcombine.low %v1589_v27, %v1603_v32 }
  0x5c   : > { %651 = vrot.lane.b32.xlu0 %v1606_v33, %s1337_s7  ;;  %708 = vrot.lane.b32.xlu1 %v1614_v37, %s1338_s8  ;;  %v517_v22 = vsel %vm1518_vm5, %v512_v46, %v516_v60  ;;  %v537_v2 = vsel %vm1476_vm4, %v535_v20, %v536_v6  ;;  %v1096_v40 = vcombine.low %v328_v21, %v338_v24 }
  0x5d   : > { %v527_v30 = vsel %vm1518_vm5, %v522_v25, %v526_v13  ;;  %v1112_v34 = vcombine.low %v534_v19, %v537_v2  ;;  %1129 = vmatprep.subr.bf16.mxu0 %v1345_v35  ;;  %v1799_v56 = vcombine.low %v1640_v57, %v1648_v1  ;;  %v1107_v27 = vcombine.low %v1670_v26, %v1683_v41 }
  0x5e   : > { %v1111_v52 = vcombine.low %v517_v22, %v527_v30  ;;  %v1110_v49 = vcombine.low %v1707_v15, %v1714_v7  ;;  %1145 = vmatprep.mubr.msk.bf16.mxu0 %vm1346_vm6, %v1345_v35 }
  0x60   : > { %689 = vrot.lane.b32.xlu0 %v1620_v31, %s1341_s21  ;;  %746 = vrot.lane.b32.xlu1 %v1104_v14, %s1340_s18 }
  0x64   : > { %727 = vrot.lane.b32.xlu0 %v1096_v40, %s1344_s26  ;;  %634 = vrot.lane.b32.xlu1 %v1620_v31, %s1339_s17 }
  0x68   : > { %594 = vrot.lane.b32.xlu0 %v1631_v48, %s1342_s24  ;;  %672 = vrot.lane.b32.xlu1 %v1096_v40, %s1343_s25 }
  0x6c   : > { %653 = vrot.lane.b32.xlu0 %v1614_v37, %s1337_s7  ;;  %710 = vrot.lane.b32.xlu1 %v1782_v17, %s1338_s8 }
  0x70   : > { %691 = vrot.lane.b32.xlu0 %v1104_v14, %s1341_s21  ;;  %748 = vrot.lane.b32.xlu1 %v1676_v29, %s1340_s18 }
  0x74   : > { %729 = vrot.lane.b32.xlu0 %v1685_v42, %s1344_s26  ;;  %636 = vrot.lane.b32.xlu1 %v1104_v14, %s1339_s17 }
  0x78   : > { %596 = vrot.lane.b32.xlu0 %v1096_v40, %s1342_s24  ;;  %674 = vrot.lane.b32.xlu1 %v1685_v42, %s1343_s25 }
  0x7c   : > { %655 = vrot.lane.b32.xlu0 %v1782_v17, %s1337_s7  ;;  %712 = vrot.lane.b32.xlu1 %v1799_v56, %s1338_s8 }
  0x80   : > { %693 = vrot.lane.b32.xlu0 %v1676_v29, %s1341_s21  ;;  %750 = vrot.lane.b32.xlu1 %v1704_v11, %s1340_s18 }
  0x84   : > { %731 = vrot.lane.b32.xlu0 %v1720_v9, %s1344_s26  ;;  %638 = vrot.lane.b32.xlu1 %v1676_v29, %s1339_s17 }
  0x88   : > { %598 = vrot.lane.b32.xlu0 %v1685_v42, %s1342_s24  ;;  %676 = vrot.lane.b32.xlu1 %v1720_v9, %s1343_s25 }
  0x8c   : > { %657 = vrot.lane.b32.xlu0 %v1799_v56, %s1337_s7  ;;  %714 = vrot.lane.b32.xlu1 %v1107_v27, %s1338_s8 }
  0x90   : > { %695 = vrot.lane.b32.xlu0 %v1704_v11, %s1341_s21  ;;  %752 = vrot.lane.b32.xlu1 %v1741_v58, %s1340_s18 }
  0x93   : > { %v646_v32 = vpop.permute.xlu1 %645 }
  0x94   : > { %733 = vrot.lane.b32.xlu0 %v1108_v0, %s1344_s26  ;;  %640 = vrot.lane.b32.xlu1 %v1704_v11, %s1339_s17  ;;  %v648_v31 = vpop.permute.xlu0 %647 }
  0x97   : > { %v703_v48 = vpop.permute.xlu1 %702 }
  0x98   : > { %600 = vrot.lane.b32.xlu0 %v1720_v9, %s1342_s24  ;;  %678 = vrot.lane.b32.xlu1 %v1108_v0, %s1343_s25  ;;  %s1347_s24 = smov [#allocation2]  }
  0x99   : > { %s1245_s25 = sshll.u32 %s1347_s24, 4  ;;  %s1246_s25 = int_to_ptr.vmem [resolvable:$false] %s1245_s25 }
  0x9b   : > { %v627_v57 = vpop.permute.xlu0 %626 }
  0x9c   : > { %659 = vrot.lane.b32.xlu0 %v1107_v27, %s1337_s7  ;;  %v741_v1 = vpop.permute.xlu1 %740  ;;  %716 = vrot.lane.b32.xlu1 %v1110_v49, %s1338_s8  ;;  %s150_s7 = scalar_lea.vmem [#allocation2], %s1068_s3 }
  0x9d   : > { %s989_s8 = sshll.u32 %s150_s7, 4  ;;  %s1950_s8 = int_to_ptr.vmem [resolvable:$true] %s989_s8 }
  0x9e   : > { %s1241_s13 = scalar_lea.vmem %s1950_s8, 128  ;;  %p1248_p2 = scmp.lt.s32.totalorder %s1950_s8, %s1246_s25 }
  0x9f   : > { %v684_v26 = vpop.permute.xlu0 %683  ;;  %p1242_p13 = scmp.ne.s32.totalorder %s1950_s8, %s1241_s13 }
  0xa0   : > { %697 = vrot.lane.b32.xlu0 %v1741_v58, %s1341_s21  ;;  %v629_v29 = vpop.permute.xlu1 %628  ;;  %754 = vrot.lane.b32.xlu1 %v1112_v34, %s1340_s18  ;;  %s1948_s21 = scalar_lea.hbm %s2003_s2, %s1116_s6 }
  0xa1   : > { %p1243_p0 = pnand %p1242_p13, %p1414_p3 }
  0xa3   : > { %p1244_p1 = pneg %p1243_p0 }
  0xa4   : > { %735 = vrot.lane.b32.xlu0 %v1111_v52, %s1344_s26  ;;  %s1247_s26 = scalar_lea.vmem %s1246_s25, 256 }
  0xa5   : > { %v587_v41 = vpop.permute.xlu0 %586  ;;  %v665_v44 = vpop.permute.xlu1 %664  ;;  %p1249_p4 = scmp.lt.s32.totalorder %s1247_s26, %s1241_s13 }
  0xa6   : > { %v759_v42 = vsel %vm756_vm7, %v1083_v61, %v587_v41 }
  0xa7   : > { %v783_v11 = vsel %vm781_vm8, %v759_v42, %v627_v57  ;;  %p1250_p5 = por %p1249_p4, %p1248_p2 }
  0xa8   : > { %v800_v15 = vsel %vm798_vm9, %v783_v11, %v646_v32 }
  0xa9   : > { %v817_v7 = vsel %vm815_vm10, %v800_v15, %v665_v44  ;;  %p1251_p6 = pnand %p1250_p5, %p1244_p1 }
  0xaa   : > { %v834_v9 = vsel %vm832_vm11, %v817_v7, %v684_v26  ;;  %v722_v36 = vpop.permute.xlu0 %721  ;;  %v667_v38 = vpop.permute.xlu1 %666 }
  0xab   : > { %v851_v12 = vsel %vm849_vm12, %v834_v9, %v703_v48 }
  0xac   : > { %v868_v16 = vsel %vm866_vm13, %v851_v12, %v722_v36 }
  0xad   : > { %v885_v39 = vsel %vm883_vm14, %v868_v16, %v741_v1 }
  0xae   : > { %v589_v3 = vpop.permute.xlu0 %588  ;;  %v902_v43 = vsel %vm900_vm15, %v885_v39, 1065369472  ;;  %v705_v45 = vpop.permute.xlu1 %704 }
  0xaf   : > { %v762_v50 = vsel %vm756_vm7, %v1452_v5, %v589_v3  ;;  %v915_v51 = vsel %vm911_vm0, %v902_v43, 0 }
  0xb0   : > { %v785_v53 = vsel %vm781_vm8, %v762_v50, %v629_v29  ;;  %1130 = vmatpush3.bf16.xpose.msra.mxu0 %v915_v51 }
  0xb1   : > { %v802_v54 = vsel %vm798_vm9, %v785_v53, %v648_v31  ;;  %1131 = vmatprep.subr.bf16.mxu0 %v1345_v35 }
  0xb2   : > { %v819_v23 = vsel %vm815_vm10, %v802_v54, %v667_v38  ;;  %v686_v58 = vpop.permute.xlu0 %685  ;;  %v743_v18 = vpop.permute.xlu1 %742 }
  0xb3   : > { %v836_v55 = vsel %vm832_vm11, %v819_v23, %v686_v58 }
  0xb4   : > { %v853_v59 = vsel %vm849_vm12, %v836_v55, %v705_v45 }
  0xb6   : > { %v724_v60 = vpop.permute.xlu0 %723  ;;  %v631_v62 = vpop.permute.xlu1 %630 }
  0xb7   : > { %v870_v5 = vsel %vm866_vm13, %v853_v59, %v724_v60 }
  0xb8   : > { %v887_v63 = vsel %vm883_vm14, %v870_v5, %v743_v18 }
  0xb9   : > { %v903_v0 = vsel %vm900_vm15, %v887_v63, 1065369472 }
  0xba   : > { %v591_v4 = vpop.permute.xlu0 %590  ;;  %v917_v28 = vsel %vm911_vm0, %v903_v0, 0  ;;  %v669_v6 = vpop.permute.xlu1 %668 }
  0xbb   : > { %v765_v8 = vsel %vm756_vm7, %v1460_v10, %v591_v4  ;;  %1132 = vmatpush3.bf16.xpose.msra.mxu0 %v917_v28 }
  0xbc   : > { %1133 = vmatprep.subr.bf16.mxu0 %v1345_v35  ;;  %v787_v13 = vsel %vm781_vm8, %v765_v8, %v631_v62 }
  0xbe   : > { %v650_v61 = vpop.permute.xlu0 %649  ;;  %v707_v14 = vpop.permute.xlu1 %706 }
  0xbf   : > { %v804_v46 = vsel %vm798_vm9, %v787_v13, %v650_v61 }
  0xc0   : > { %v821_v19 = vsel %vm815_vm10, %v804_v46, %v669_v6 }
  0xc2   : > { %v688_v20 = vpop.permute.xlu0 %687  ;;  %v745_v21 = vpop.permute.xlu1 %744 }
  0xc3   : > { %v838_v24 = vsel %vm832_vm11, %v821_v19, %v688_v20 }
  0xc4   : > { %v855_v25 = vsel %vm849_vm12, %v838_v24, %v707_v14 }
  0xc6   : > { %v726_v22 = vpop.permute.xlu0 %725  ;;  %v633_v2 = vpop.permute.xlu1 %632 }
  0xc7   : > { %v872_v10 = vsel %vm866_vm13, %v855_v25, %v726_v22 }
  0xc8   : > { %v889_v30 = vsel %vm883_vm14, %v872_v10, %v745_v21 }
  0xc9   : > { %v904_v34 = vsel %vm900_vm15, %v889_v30, 1065369472 }
  0xca   : > { %v593_v40 = vpop.permute.xlu0 %592  ;;  %v919_v52 = vsel %vm911_vm0, %v904_v34, 0  ;;  %v671_v27 = vpop.permute.xlu1 %670 }
  0xcb   : > { %v768_v32 = vsel %vm756_vm7, %v1554_v47, %v593_v40  ;;  %1134 = vmatpush3.bf16.xpose.msra.mxu0 %v919_v52 }
  0xcc   : > { %1135 = vmatprep.subr.bf16.mxu0 %v1345_v35  ;;  %v789_v31 = vsel %vm781_vm8, %v768_v32, %v633_v2 }
  0xce   : > { %v652_v48 = vpop.permute.xlu0 %651  ;;  %v709_v49 = vpop.permute.xlu1 %708 }
  0xcf   : > { %v806_v57 = vsel %vm798_vm9, %v789_v31, %v652_v48 }
  0xd0   : > { %v823_v1 = vsel %vm815_vm10, %v806_v57, %v671_v27 }
  0xd2   : > { %v690_v26 = vpop.permute.xlu0 %689  ;;  %v747_v29 = vpop.permute.xlu1 %746 }
  0xd3   : > { %v840_v41 = vsel %vm832_vm11, %v823_v1, %v690_v26 }
  0xd4   : > { %v857_v42 = vsel %vm849_vm12, %v840_v41, %v709_v49 }
  0xd6   : > { %v728_v44 = vpop.permute.xlu0 %727  ;;  %v635_v11 = vpop.permute.xlu1 %634 }
  0xd7   : > { %v874_v47 = vsel %vm866_vm13, %v857_v42, %v728_v44 }
  0xd8   : > { %v891_v15 = vsel %vm883_vm14, %v874_v47, %v747_v29 }
  0xd9   : > { %v905_v7 = vsel %vm900_vm15, %v891_v15, 1065369472 }
  0xda   : > { %v595_v9 = vpop.permute.xlu0 %594  ;;  %v921_v36 = vsel %vm911_vm0, %v905_v7, 0  ;;  %v673_v38 = vpop.permute.xlu1 %672 }
  0xdb   : > { %v771_v12 = vsel %vm756_vm7, %v1606_v33, %v595_v9  ;;  %1136 = vmatpush3.bf16.xpose.msra.mxu0 %v921_v36 }
  0xdc   : > { %1137 = vmatprep.subr.bf16.mxu0 %v1345_v35  ;;  %v791_v16 = vsel %vm781_vm8, %v771_v12, %v635_v11 }
  0xde   : > { %v654_v39 = vpop.permute.xlu0 %653  ;;  %v711_v3 = vpop.permute.xlu1 %710 }
  0xdf   : > { %v808_v43 = vsel %vm798_vm9, %v791_v16, %v654_v39 }
  0xe0   : > { %v825_v45 = vsel %vm815_vm10, %v808_v43, %v673_v38 }
  0xe2   : > { %v692_v50 = vpop.permute.xlu0 %691  ;;  %v749_v51 = vpop.permute.xlu1 %748 }
  0xe3   : > { %v842_v53 = vsel %vm832_vm11, %v825_v45, %v692_v50  ;;  %v910_v45 = vld [vmem:[%s2002_s1] sm:$0xf] }
  0xe4   : > { %v859_v54 = vsel %vm849_vm12, %v842_v53, %v711_v3 }
  0xe6   : > { %v730_v23 = vpop.permute.xlu0 %729  ;;  %v637_v58 = vpop.permute.xlu1 %636 }
  0xe7   : > { %v876_v33 = vsel %vm866_vm13, %v859_v54, %v730_v23 }
  0xe8   : > { %v893_v18 = vsel %vm883_vm14, %v876_v33, %v749_v51 }
  0xe9   : > { %v906_v55 = vsel %vm900_vm15, %v893_v18, 1065369472 }
  0xea   : > { %v597_v59 = vpop.permute.xlu0 %596  ;;  %v923_v60 = vsel %vm911_vm0, %v906_v55, 0  ;;  %v675_v62 = vpop.permute.xlu1 %674 }
  0xeb   : > { %v774_v5 = vsel %vm756_vm7, %v1614_v37, %v597_v59  ;;  %1138 = vmatpush3.bf16.xpose.msra.mxu0 %v923_v60 }
  0xec   : > { %1139 = vmatprep.subr.bf16.mxu0 %v1345_v35  ;;  %v793_v63 = vsel %vm781_vm8, %v774_v5, %v637_v58 }
  0xee   : > { %v656_v0 = vpop.permute.xlu0 %655  ;;  %v713_v4 = vpop.permute.xlu1 %712 }
  0xef   : > { %v810_v28 = vsel %vm798_vm9, %v793_v63, %v656_v0 }
  0xf0   : > { %v827_v6 = vsel %vm815_vm10, %v810_v28, %v675_v62 }
  0xf2   : > { %v694_v8 = vpop.permute.xlu0 %693  ;;  %v751_v13 = vpop.permute.xlu1 %750 }
  0xf3   : > { %v844_v61 = vsel %vm832_vm11, %v827_v6, %v694_v8 }
  0xf4   : > { %v861_v14 = vsel %vm849_vm12, %v844_v61, %v713_v4 }
  0xf6   : > { %v732_v46 = vpop.permute.xlu0 %731  ;;  %v639_v19 = vpop.permute.xlu1 %638 }
  0xf7   : > { %v878_v37 = vsel %vm866_vm13, %v861_v14, %v732_v46 }
  0xf8   : > { %v895_v20 = vsel %vm883_vm14, %v878_v37, %v751_v13 }
  0xf9   : > { %v907_v21 = vsel %vm900_vm15, %v895_v20, 1065369472 }
  0xfa   : > { %v599_v24 = vpop.permute.xlu0 %598  ;;  %v925_v25 = vsel %vm911_vm0, %v907_v21, 0  ;;  %v677_v22 = vpop.permute.xlu1 %676 }
  0xfb   : > { %v777_v2 = vsel %vm756_vm7, %v1782_v17, %v599_v24  ;;  %1140 = vmatpush3.bf16.xpose.msra.mxu0 %v925_v25 }
  0xfc   : > { %1141 = vmatprep.subr.bf16.mxu0 %v1345_v35  ;;  %v795_v10 = vsel %vm781_vm8, %v777_v2, %v639_v19 }
  0xfe   : > { %v658_v30 = vpop.permute.xlu0 %657  ;;  %v715_v34 = vpop.permute.xlu1 %714 }
  0xff   : > { %v812_v40 = vsel %vm798_vm9, %v795_v10, %v658_v30 }
 0x100   : > { %v829_v52 = vsel %vm815_vm10, %v812_v40, %v677_v22 }
 0x102   : > { %v696_v27 = vpop.permute.xlu0 %695  ;;  %v753_v32 = vpop.permute.xlu1 %752 }
 0x103   : > { %v846_v31 = vsel %vm832_vm11, %v829_v52, %v696_v27 }
 0x104   : > { %v863_v48 = vsel %vm849_vm12, %v846_v31, %v715_v34 }
 0x106   : > { %v734_v49 = vpop.permute.xlu0 %733  ;;  %v641_v57 = vpop.permute.xlu1 %640 }
 0x107   : > { %v880_v17 = vsel %vm866_vm13, %v863_v48, %v734_v49 }
 0x108   : > { %v897_v1 = vsel %vm883_vm14, %v880_v17, %v753_v32 }
 0x109   : > { %v908_v26 = vsel %vm900_vm15, %v897_v1, 1065369472 }
 0x10a   : > { %v601_v29 = vpop.permute.xlu0 %600  ;;  %v927_v41 = vsel %vm911_vm0, %v908_v26, 0  ;;  %v679_v42 = vpop.permute.xlu1 %678 }
 0x10b   : > { %v780_v44 = vsel %vm756_vm7, %v1799_v56, %v601_v29  ;;  %1142 = vmatpush3.bf16.xpose.msra.mxu0 %v927_v41 }
 0x10c   : > { %1143 = vmatprep.subr.bf16.mxu0 %v1345_v35  ;;  %v797_v11 = vsel %vm781_vm8, %v780_v44, %v641_v57 }
 0x10e   : > { %v660_v47 = vpop.permute.xlu0 %659  ;;  %v717_v7 = vpop.permute.xlu1 %716 }
 0x10f   : > { %v814_v15 = vsel %vm798_vm9, %v797_v11, %v660_v47 }
 0x110   : > { %v831_v9 = vsel %vm815_vm10, %v814_v15, %v679_v42 }
 0x112   : > { %v698_v36 = vpop.permute.xlu0 %697  ;;  %v755_v12 = vpop.permute.xlu1 %754 }
 0x113   : > { %v848_v38 = vsel %vm832_vm11, %v831_v9, %v698_v36 }
 0x114   : > { %v865_v56 = vsel %vm849_vm12, %v848_v38, %v717_v7 }
 0x116   : > { %v736_v16 = vpop.permute.xlu0 %735 }
 0x117   : > { %v882_v35 = vsel %vm866_vm13, %v865_v56, %v736_v16 }
 0x118   : > { %v899_v39 = vsel %vm883_vm14, %v882_v35, %v755_v12 }
 0x119   : > { %v909_v3 = vsel %vm900_vm15, %v899_v39, 1065369472 }
 0x11a   : > { %v929_v43 = vsel %vm911_vm0, %v909_v3, 0 }
 0x11b   : > { %1144 = vmatpush3.bf16.xpose.msra.mxu0 %v929_v43 }
 0x122   : > { %1146 = vmatmul.mubr.msk.bf16.vlgmr.msra.gmra.mrb[0].mxu0 %vm911_vm0, %v910_v45 }
 0x1f5   : > { %v965_v50 = vpop.f32.mrb[0].mxu0 }
 0x1f6   : > { %v971_v51 = vmax.f32 %v965_v50, 0.0  ;;  %v1147_v53 = vpop.f32.mrb[1].mxu0 }
 0x1f7   : > { %v968_v54 = vpop.f32.mrb[2].mxu0 }
 0x1f8   : > { %972 = vst [vmem:[%s150_s7] sm:$0xff] %v971_v51  ;;  %v1148_v23 = vpop.f32.mrb[3].mxu0 }
 0x1f9   : > { %1254 = shalt.err (!%p1251_p6)
}
 0x1fa   : > { %s1255_s28 = scalar_lea.hbm %s1948_s21, 128  ;;  %s1259_s3 = scalar_lea.hbm %s2003_s2, 512 }
 0x1fb   : > { %p1256_p7 = scmp.ne.s32.totalorder %s1948_s21, %s1255_s28  ;;  %p1260_p11 = scmp.lt.u32.totalorder %s1948_s21, %s2003_s2 }
 0x1fc   : > { %p1261_p12 = scmp.lt.u32.totalorder %s1259_s3, %s1255_s28  ;;  %p1263_p0 = scmp.lt.u32.totalorder %s1255_s28, %s1948_s21 }
 0x1fd   : > { %p1257_p9 = pnand %p1256_p7, %p1414_p3 }
 0x1fe   : > { %p1262_p13 = por %p1261_p12, %p1260_p11 }
 0x1ff   : > { %p1258_p10 = pneg %p1257_p9 }
 0x200   : > { %p1264_p1 = por %p1263_p0, %p1262_p13 }
 0x202   : > { %p1265_p2 = pnand %p1264_p1, %p1258_p10 }
 0x204   : > { %1268 = shalt.err (!%p1265_p2)
}
 0x205   : > { %1150 = dma.vmem_to_hbm [thread:$0]  (%p1414_p3), %s1950_s8, 128, %s1948_s21, %s974_s12  }
 0x206 PF: > { %p1156_p4 = scmp.ge.s32.totalorder %s1335_s16, 2  ;;  %s1001_s6 = sand.u32 1, %s1307_s9  }
 0x207   : > { %s1002_s7 = scalar_lea.sflag [#allocation3], %s1001_s6 }
 0x208   : > { %p1153_p5 = pnand %p1156_p4, %p1423_p8 }
 0x20a   : > { %1302 = dma.done.wait (!%p1153_p5), %s1002_s7, 128  }
 0x20b   : > { %1304 = vsyncadd (!%p1153_p5), %s1002_s7, 4294967168  ;;  %s15_s16 = sadd.s32 1, %s1335_s16   ;;  %s2010_s9 = smov %s1311_s10 }
 0x20c   : > { %p12_p6 = scmp.ge.s32.totalorder %s15_s16, 6   ;;  %s2011_s10 = smov %s1315_s11 }
 0x20d   : > { %s2012_s11 = smov %s1432_s27  ;;  %s2013_s12 = smov %s1327_s14 }
 0x20e   : > { %s2014_s13 = smov %s1331_s15  ;;  %s2015_s14 = smov %s2018_s19 }
 0x20f   : > { %s2016_s15 = smov %s2022_s20  ;;  %14 = sbr.rel (!%p12_p6) target bundleno = 5 (0x5), region = 64 }
 0x216   :  { %1007 = vsyncpa [#allocation3], 1 }
 0x217   :  { %1009 = vsyncpa [#allocation3 + $0x1], 1 }

</bundles_post_ra>
